<compile_context>
chip_gen: v6e
topology: v6e:2x2x1
jax: 0.10.0
libtpu: 0.0.40
codegen_flags: <defaults>
</compile_context>

<pallas_src>
import jax
import jax.numpy as jnp
from jax.experimental import pallas as pl
from jax.experimental.pallas import tpu as pltpu

INPUT_SIZE = 10
HIDDEN_SIZE = 10
NUM_CLASSES = 1
BLOCK_BATCH = 4096  # lane-dense batch tile (multiple of 128); clamped for small batches


def _mlp_kernel(x_ref, w123_ref, b123_ref, w5_ref, b5_ref, o_ref):
    # x_ref: (INPUT_SIZE, Bt) feature-major tile. Weights are PyTorch (out, in) form,
    # so each layer is h = W @ x_tile with the batch on the 128-lane axis.
    x = x_ref[...]
    h = jnp.dot(w123_ref[0], x, preferred_element_type=jnp.float32) + b123_ref[0]
    h = jnp.maximum(h, 0.0)
    h = jnp.dot(w123_ref[1], h, preferred_element_type=jnp.float32) + b123_ref[1]
    h = jnp.maximum(h, 0.0)
    h = jnp.dot(w123_ref[2], h, preferred_element_type=jnp.float32) + b123_ref[2]
    h = jnp.maximum(h, 0.0)
    # fc5 (10 -> 1): VPU multiply + XLU sublane-reduce instead of a 1-wide MXU matmul.
    out = jnp.sum(w5_ref[...] * h, axis=0, keepdims=True) + b5_ref[...]
    o_ref[...] = out.astype(o_ref.dtype)


def _round_up(n, m):
    return ((n + m - 1) // m) * m


@jax.jit
def neural_net_forward(x, params):
    """x: (B, INPUT_SIZE) f32 -> (B, NUM_CLASSES) f32."""
    B = x.shape[0]
    bt = min(BLOCK_BATCH, _round_up(B, 128))   # lane-dense batch tile
    bp = _round_up(B, bt)                      # padded batch (multiple of bt)
    num_tiles = bp // bt

    # Feature-major input, zero-padded along the batch (lane) axis.
    xt = jnp.zeros((INPUT_SIZE, bp), jnp.float32).at[:, :B].set(x.T)

    # Pack the three hidden layers into single weight / bias slabs (fewer tiny DMAs).
    w123 = jnp.stack([params["w1"], params["w2"], params["w3"]])   # (3, H, H) in (out, in) form
    b123 = jnp.stack([params["b1"], params["b2"], params["b3"]])   # (3, H, 1)
    w5 = params["w5"]                                              # (H, 1) column
    b5 = params["b5"]                                              # (1, 1)

    out_t = pl.pallas_call(
        _mlp_kernel,
        out_shape=jax.ShapeDtypeStruct((NUM_CLASSES, bp), jnp.float32),
        grid=(num_tiles,),
        in_specs=[
            pl.BlockSpec((INPUT_SIZE, bt), lambda i: (0, i)),                 # x tiles (pipelined)
            pl.BlockSpec((3, HIDDEN_SIZE, HIDDEN_SIZE), lambda i: (0, 0, 0)),  # resident weights
            pl.BlockSpec((3, HIDDEN_SIZE, 1), lambda i: (0, 0, 0)),            # resident biases
            pl.BlockSpec((HIDDEN_SIZE, 1), lambda i: (0, 0)),                  # fc5 weight column
            pl.BlockSpec((1, 1), lambda i: (0, 0)),                            # fc5 bias
        ],
        out_specs=pl.BlockSpec((NUM_CLASSES, bt), lambda i: (0, i)),
        compiler_params=pltpu.CompilerParams(
            dimension_semantics=("parallel",),
        ),
        cost_estimate=pl.CostEstimate(
            flops=620 * bp, transcendentals=0, bytes_accessed=44 * bp + 2048),
    )(xt, w123, b123, w5, b5)

    return out_t[:, :B].T


def init_params(key):
    """PyTorch nn.Linear default init: U(-1/sqrt(fan_in), 1/sqrt(fan_in)).
    w1..w3 are stored in PyTorch (out_features, in_features) form, biases as (out, 1)
    columns; fc5's weight is stored as a (HIDDEN_SIZE, 1) column (its transpose)."""
    def linear(k, fan_in, fan_out):
        kw, kb = jax.random.split(k)
        bound = 1.0 / jnp.sqrt(fan_in)
        w = jax.random.uniform(kw, (fan_out, fan_in), jnp.float32, -bound, bound)
        b = jax.random.uniform(kb, (fan_out, 1), jnp.float32, -bound, bound)
        return w, b

    k1, k2, k3, k5 = jax.random.split(key, 4)
    w1, b1 = linear(k1, INPUT_SIZE, HIDDEN_SIZE)
    w2, b2 = linear(k2, HIDDEN_SIZE, HIDDEN_SIZE)
    w3, b3 = linear(k3, HIDDEN_SIZE, HIDDEN_SIZE)
    w5, b5 = linear(k5, HIDDEN_SIZE, NUM_CLASSES)
    return dict(w1=w1, b1=b1, w2=w2, b2=b2, w3=w3, b3=b3,
                w5=w5.T, b5=b5)  # w5 kept as a (HIDDEN_SIZE, 1) column


def _reference_forward(x, p):
    h = jnp.maximum(x @ p["w1"].T + p["b1"].T, 0.0)
    h = jnp.maximum(h @ p["w2"].T + p["b2"].T, 0.0)
    h = jnp.maximum(h @ p["w3"].T + p["b3"].T, 0.0)
    return h @ p["w5"] + p["b5"].T


if __name__ == "__main__":
    key = jax.random.PRNGKey(0)
    kx, kp = jax.random.split(key)

    batch = 8
    # Inputs in [0, 1], mirroring the MinMaxScaler preprocessing in the source script.
    x = jax.random.uniform(kx, (batch, INPUT_SIZE), jnp.float32, 0.0, 1.0)
    params = init_params(kp)

    out = neural_net_forward(x, params)
    out = jax.block_until_ready(out)

    ref = _reference_forward(x, params)
    assert out.shape == (batch, NUM_CLASSES)
    assert jnp.allclose(out, ref, atol=1e-4, rtol=1e-4)

    print("KERNEL_OK")
</pallas_src>

<mosaic_0001>
module attributes {stable_mosaic.version = 11 : i64} {
  func.func @_mlp_kernel(%arg0: i32, %arg1: memref<10x128xf32, #tpu.memory_space<vmem>>, %arg2: memref<3x10x10xf32, #tpu.memory_space<vmem>>, %arg3: memref<3x10x1xf32, #tpu.memory_space<vmem>>, %arg4: memref<10x1xf32, #tpu.memory_space<vmem>>, %arg5: memref<1x1xf32, #tpu.memory_space<vmem>>, %arg6: memref<1x128xf32, #tpu.memory_space<vmem>>) attributes {dimension_semantics = [#tpu.dimension_semantics<parallel>], iteration_bounds = array<i64: 1>, scalar_prefetch = 0 : i64, scratch_operands = 0 : i64, tpu.core_type = #tpu.core_type<tc>, window_params = [{transform_indices = @transform_0, window_bounds = array<i64: 10, 128>}, {pipeline_mode = #tpu.pipeline_mode<synchronous>, transform_indices = @transform_1, window_bounds = array<i64: 3, 10, 10>}, {pipeline_mode = #tpu.pipeline_mode<synchronous>, transform_indices = @transform_2, window_bounds = array<i64: 3, 10, 1>}, {pipeline_mode = #tpu.pipeline_mode<synchronous>, transform_indices = @transform_3, window_bounds = array<i64: 10, 1>}, {pipeline_mode = #tpu.pipeline_mode<synchronous>, transform_indices = @transform_4, window_bounds = array<i64: 1, 1>}, {transform_indices = @transform_5, window_bounds = array<i64: 1, 128>}]} {
    %c0 = arith.constant 0 : index
    %c0_0 = arith.constant 0 : index
    %0 = vector.load %arg1[%c0, %c0_0] : memref<10x128xf32, #tpu.memory_space<vmem>>, vector<10x128xf32>
    %c0_1 = arith.constant 0 : index
    %c0_2 = arith.constant 0 : index
    %c0_3 = arith.constant 0 : index
    %1 = vector.load %arg2[%c0_1, %c0_2, %c0_3] : memref<3x10x10xf32, #tpu.memory_space<vmem>>, vector<1x10x10xf32>
    %2 = vector.shape_cast %1 : vector<1x10x10xf32> to vector<10x10xf32>
    %cst = arith.constant dense<0.000000e+00> : vector<10x128xf32>
    %3 = tpu.matmul %2, %0, %cst {dimension_numbers = #tpu.dot_dimension_numbers<[1], [0], [0], [1], [0, 0, 1, 1], [], []>} : vector<10x10xf32>, vector<10x128xf32>, vector<10x128xf32> -> vector<10x128xf32>
    %c0_4 = arith.constant 0 : index
    %c0_5 = arith.constant 0 : index
    %c0_6 = arith.constant 0 : index
    %4 = vector.load %arg3[%c0_4, %c0_5, %c0_6] : memref<3x10x1xf32, #tpu.memory_space<vmem>>, vector<1x10x1xf32>
    %5 = vector.shape_cast %4 : vector<1x10x1xf32> to vector<10x1xf32>
    %6 = vector.broadcast %5 : vector<10x1xf32> to vector<10x128xf32>
    %7 = arith.addf %3, %6 : vector<10x128xf32>
    %cst_7 = arith.constant 0.000000e+00 : f32
    %8 = vector.broadcast %cst_7 : f32 to vector<10x128xf32>
    %9 = arith.maximumf %7, %8 : vector<10x128xf32>
    %c1 = arith.constant 1 : index
    %c0_8 = arith.constant 0 : index
    %c0_9 = arith.constant 0 : index
    %10 = vector.load %arg2[%c1, %c0_8, %c0_9] : memref<3x10x10xf32, #tpu.memory_space<vmem>>, vector<1x10x10xf32>
    %11 = vector.shape_cast %10 : vector<1x10x10xf32> to vector<10x10xf32>
    %cst_10 = arith.constant dense<0.000000e+00> : vector<10x128xf32>
    %12 = tpu.matmul %11, %9, %cst_10 {dimension_numbers = #tpu.dot_dimension_numbers<[1], [0], [0], [1], [0, 0, 1, 1], [], []>} : vector<10x10xf32>, vector<10x128xf32>, vector<10x128xf32> -> vector<10x128xf32>
    %c1_11 = arith.constant 1 : index
    %c0_12 = arith.constant 0 : index
    %c0_13 = arith.constant 0 : index
    %13 = vector.load %arg3[%c1_11, %c0_12, %c0_13] : memref<3x10x1xf32, #tpu.memory_space<vmem>>, vector<1x10x1xf32>
    %14 = vector.shape_cast %13 : vector<1x10x1xf32> to vector<10x1xf32>
    %15 = vector.broadcast %14 : vector<10x1xf32> to vector<10x128xf32>
    %16 = arith.addf %12, %15 : vector<10x128xf32>
    %cst_14 = arith.constant 0.000000e+00 : f32
    %17 = vector.broadcast %cst_14 : f32 to vector<10x128xf32>
    %18 = arith.maximumf %16, %17 : vector<10x128xf32>
    %c2 = arith.constant 2 : index
    %c0_15 = arith.constant 0 : index
    %c0_16 = arith.constant 0 : index
    %19 = vector.load %arg2[%c2, %c0_15, %c0_16] : memref<3x10x10xf32, #tpu.memory_space<vmem>>, vector<1x10x10xf32>
    %20 = vector.shape_cast %19 : vector<1x10x10xf32> to vector<10x10xf32>
    %cst_17 = arith.constant dense<0.000000e+00> : vector<10x128xf32>
    %21 = tpu.matmul %20, %18, %cst_17 {dimension_numbers = #tpu.dot_dimension_numbers<[1], [0], [0], [1], [0, 0, 1, 1], [], []>} : vector<10x10xf32>, vector<10x128xf32>, vector<10x128xf32> -> vector<10x128xf32>
    %c2_18 = arith.constant 2 : index
    %c0_19 = arith.constant 0 : index
    %c0_20 = arith.constant 0 : index
    %22 = vector.load %arg3[%c2_18, %c0_19, %c0_20] : memref<3x10x1xf32, #tpu.memory_space<vmem>>, vector<1x10x1xf32>
    %23 = vector.shape_cast %22 : vector<1x10x1xf32> to vector<10x1xf32>
    %24 = vector.broadcast %23 : vector<10x1xf32> to vector<10x128xf32>
    %25 = arith.addf %21, %24 : vector<10x128xf32>
    %cst_21 = arith.constant 0.000000e+00 : f32
    %26 = vector.broadcast %cst_21 : f32 to vector<10x128xf32>
    %27 = arith.maximumf %25, %26 : vector<10x128xf32>
    %c0_22 = arith.constant 0 : index
    %c0_23 = arith.constant 0 : index
    %28 = vector.load %arg4[%c0_22, %c0_23] : memref<10x1xf32, #tpu.memory_space<vmem>>, vector<10x1xf32>
    %29 = vector.broadcast %28 : vector<10x1xf32> to vector<10x128xf32>
    %30 = arith.mulf %29, %27 : vector<10x128xf32>
    %cst_24 = arith.constant dense<0.000000e+00> : vector<128xf32>
    %31 = vector.multi_reduction <add>, %30, %cst_24 [0] : vector<10x128xf32> to vector<128xf32>
    %32 = vector.shape_cast %31 : vector<128xf32> to vector<1x128xf32>
    %c0_25 = arith.constant 0 : index
    %c0_26 = arith.constant 0 : index
    %33 = vector.load %arg5[%c0_25, %c0_26] : memref<1x1xf32, #tpu.memory_space<vmem>>, vector<1x1xf32>
    %34 = vector.broadcast %33 : vector<1x1xf32> to vector<1x128xf32>
    %35 = arith.addf %32, %34 : vector<1x128xf32>
    %c0_27 = arith.constant 0 : index
    %c0_28 = arith.constant 0 : index
    %36 = vector.load %arg6[%c0_27, %c0_28] : memref<1x128xf32, #tpu.memory_space<vmem>>, vector<1x128xf32>
    tpu.vector_store %arg6[%c0_27, %c0_28], %35 {strides = array<i32>} : memref<1x128xf32, #tpu.memory_space<vmem>>, vector<1x128xf32>,
    return
  }
  func.func @transform_0(%arg0: i32) -> (i32, i32) {
    %c0_i32 = arith.constant 0 : i32
    %c0_i32_0 = arith.constant 0 : i32
    return %c0_i32, %arg0 : i32, i32
  }
  func.func @transform_1(%arg0: i32) -> (i32, i32, i32) {
    %c0_i32 = arith.constant 0 : i32
    %c0_i32_0 = arith.constant 0 : i32
    %c0_i32_1 = arith.constant 0 : i32
    %c0_i32_2 = arith.constant 0 : i32
    return %c0_i32, %c0_i32_0, %c0_i32_1 : i32, i32, i32
  }
  func.func @transform_2(%arg0: i32) -> (i32, i32, i32) {
    %c0_i32 = arith.constant 0 : i32
    %c0_i32_0 = arith.constant 0 : i32
    %c0_i32_1 = arith.constant 0 : i32
    %c0_i32_2 = arith.constant 0 : i32
    return %c0_i32, %c0_i32_0, %c0_i32_1 : i32, i32, i32
  }
  func.func @transform_3(%arg0: i32) -> (i32, i32) {
    %c0_i32 = arith.constant 0 : i32
    %c0_i32_0 = arith.constant 0 : i32
    %c0_i32_1 = arith.constant 0 : i32
    return %c0_i32, %c0_i32_0 : i32, i32
  }
  func.func @transform_4(%arg0: i32) -> (i32, i32) {
    %c0_i32 = arith.constant 0 : i32
    %c0_i32_0 = arith.constant 0 : i32
    %c0_i32_1 = arith.constant 0 : i32
    return %c0_i32, %c0_i32_0 : i32, i32
  }
  func.func @transform_5(%arg0: i32) -> (i32, i32) {
    %c0_i32 = arith.constant 0 : i32
    %c0_i32_0 = arith.constant 0 : i32
    return %c0_i32, %arg0 : i32, i32
  }
}

</mosaic_0001>

<bundles_post_ra>
// kernel: neural_net_forward.1
= control target key start
LH: loop header
LB: loop body
LE: loop exit
PB: predicated region body
PF: predicated region fallthrough
CT: control target
= control target key end

     0   :  { %vm45_vm0 = vcmask 1041408   ;;  %vm38_vm1 = vcmask 80896   ;;  %v421_v3 = vmov 0   ;;  %v358_v48 = vlaneseq  ;;  %s519_s0 = inlined_call_operand.vmem [shape: f32[10,128], index: 0, kind: input, shape index: {}]   ;;  %s520_s1 = inlined_call_operand.vmem [shape: f32[3,10,10], index: 1, kind: input, shape index: {}]   ;;  %s521_s2 = inlined_call_operand.vmem [shape: f32[3,10,1], index: 2, kind: input, shape index: {}]   ;;  %s522_s4 = inlined_call_operand.<no memory space> [shape: f32[1,1], index: 4, kind: input, shape index: {}]   ;;  %s523_s3 = inlined_call_operand.vmem [shape: f32[10,1], index: 3, kind: input, shape index: {}]   ;;  %s524_s5 = inlined_call_operand.vmem [shape: f32[1,128], index: 5, kind: output, shape index: {}]  }
   0x1   :  { %v23_v0 = vld [vmem:[%s519_s0 + $0x8] sm:$0x3]  ;;  %v22_v1 = vld [vmem:[%s519_s0] sm:$0xff]  ;;  %419 = vset.pattern.permute.xlu0 %v421_v3  ;;  %v10_v4 = vstv %s522_s4  ;;  %420 = vset.pattern.permute.xlu1 %v421_v3  ;;  %v371_v11 = vld [vmem:[%s520_s1 + $0x10] sm:$0xff] }
   0x2   :  { %v24_v2 = vld [vmem:[%s520_s1] sm:$0xff]  ;;  %397 = vmatprep.subr.msk.mxu0 %vm45_vm0, %v23_v0  ;;  %v27_v5 = vld [vmem:[%s521_s2 + $0x8] sm:$0x3]  ;;  %11 = vst [vmem:[#allocation2] sm:$0x1] %v10_v4  ;;  %408 = vmatprep.mubr.msk.f32.mxu1 %vm38_vm1, %v371_v11  ;;  %v373_v13 = vld [vmem:[%s521_s2 + $0x10] sm:$0xff] }
   0x3   :  { %401 = vmatprep.mubr.msk.f32.mxu0 %vm38_vm1, %v24_v2  ;;  %398 = vmatpush3.msk.msra.mxu0 %vm45_vm0, %v23_v0  ;;  %v25_v6 = vld [vmem:[%s520_s1 + $0x8] sm:$0x3]  ;;  %v26_v7 = vld [vmem:[%s521_s2] sm:$0xff]  ;;  %v374_v12 = vld [vmem:[%s521_s2 + $0x18] sm:$0x3]  ;;  %v359_v51 = vshrl.u32 %v358_v48, 7 }
   0x4   :  { %35 = vperm.xlu0 %419, %v27_v5   ;;  %399 = vmatprep.subr.mxu0 %v22_v1  ;;  %v381_v8 = vld [vmem:[%s521_s2 + $0x28] sm:$0x3]  ;;  %v380_v14 = vld [vmem:[%s521_s2 + $0x20] sm:$0xff]  ;;  %v372_v24 = vld [vmem:[%s520_s1 + $0x18] sm:$0x3] }
   0x5   :  { %400 = vmatpush3.msra.mxu0 %v22_v1  ;;  %v331_v9 = vld [vmem:[%s523_s3 + $0x8] sm:$0x3]  ;;  %139 = vperm.xlu1 %420, %v374_v12   ;;  %v330_v15 = vld [vmem:[%s523_s3] sm:$0xff]  ;;  %v360_v54 = vsub.s32 0, %v359_v51 }
   0x6   :  { %402 = vmatmul.mubr.msk.f32.vlgmr.msra.gmra.mxu0 %vm38_vm1, %v25_v6  ;;  %v378_v25 = vld [vmem:[%s520_s1 + $0x20] sm:$0xff]  ;;  %v379_v34 = vld [vmem:[%s520_s1 + $0x28] sm:$0x3] }
   0x7   :  { %415 = vmatprep.mubr.msk.f32.mxu0 %vm38_vm1, %v378_v25 }
   0x8   :  { %30 = vperm.xlu0 %419, %v26_v7  }
   0x9   :  { %v352_v10 = vld [vmem:[#allocation2] sm:$0x1]  ;;  %134 = vperm.xlu1 %420, %v373_v13  }
   0xc   :  { %241 = vperm.xlu0 %419, %v381_v8  }
   0xd   :  { %236 = vperm.xlu1 %420, %v380_v14  }
  0x10   :  { %339 = vperm.xlu0 %419, %v331_v9  }
  0x11   :  { %334 = vperm.xlu1 %420, %v330_v15  }
  0x14   :  { %355 = vperm.xlu0 %419, %v352_v10  }
  0x7f   :  { %v36_v16 = vpop.permute.xlu0 %35 }
  0x80   :  { %v140_v26 = vpop.permute.xlu1 %139 }
  0x83   :  { %v31_v19 = vpop.permute.xlu0 %30 }
  0x84   :  { %v135_v29 = vpop.permute.xlu1 %134 }
  0x87   :  { %v242_v35 = vpop.permute.xlu0 %241 }
  0x88   :  { %v237_v36 = vpop.permute.xlu1 %236 }
  0x8b   :  { %v340_v42 = vpop.permute.xlu0 %339 }
  0x8c   :  { %v335_v45 = vpop.permute.xlu1 %334 }
  0x8f   :  { %v356_v56 = vpop.permute.xlu0 %355 }
  0x90   :  { %v361_v58 = vrot.slane %v356_v56, %v360_v54 }
  0xc6   :  { %v403_v17 = vpop.f32.mrf.mxu0 }
  0xc7   :  { %v121_v18 = vadd.f32 %v403_v17, %v36_v16 }
  0xc8   :  { %v115_v20 = vpop.f32.mrf.mxu0 }
  0xc9   :  { %v125_v21 = vmax.f32 %v121_v18, 0.0  ;;  %v116_v22 = vadd.f32 %v115_v20, %v31_v19 }
  0xcb   :  { %v124_v23 = vmax.f32 %v116_v22, 0.0  ;;  %404 = vmatprep.subr.msk.mxu1 %vm45_vm0, %v125_v21 }
  0xcc   :  { %405 = vmatpush3.msk.msra.mxu1 %vm45_vm0, %v125_v21 }
  0xcd   :  { %406 = vmatprep.subr.mxu1 %v124_v23 }
  0xce   :  { %407 = vmatpush3.msra.mxu1 %v124_v23 }
  0xcf   :  { %409 = vmatmul.mubr.msk.f32.vlgmr.msra.gmra.mxu1 %vm38_vm1, %v372_v24 }
 0x18f   :  { %v410_v27 = vpop.f32.mrf.mxu1 }
 0x190   :  { %v223_v28 = vadd.f32 %v410_v27, %v140_v26 }
 0x191   :  { %v217_v30 = vpop.f32.mrf.mxu1 }
 0x192   :  { %v227_v31 = vmax.f32 %v223_v28, 0.0  ;;  %v218_v32 = vadd.f32 %v217_v30, %v135_v29 }
 0x194   :  { %v226_v33 = vmax.f32 %v218_v32, 0.0  ;;  %411 = vmatprep.subr.msk.mxu0 %vm45_vm0, %v227_v31 }
 0x195   :  { %412 = vmatpush3.msk.msra.mxu0 %vm45_vm0, %v227_v31 }
 0x196   :  { %413 = vmatprep.subr.mxu0 %v226_v33 }
 0x197   :  { %414 = vmatpush3.msra.mxu0 %v226_v33 }
 0x198   :  { %416 = vmatmul.mubr.msk.f32.vlgmr.msra.gmra.mxu0 %vm38_vm1, %v379_v34 }
 0x258   :  { %v417_v37 = vpop.f32.mrf.mxu0 }
 0x259   :  { %v325_v38 = vadd.f32 %v417_v37, %v242_v35 }
 0x25a   :  { %v319_v39 = vpop.f32.mrf.mxu0 }
 0x25b   :  { %v329_v40 = vmax.f32 %v325_v38, 0.0  ;;  %v320_v41 = vadd.f32 %v319_v39, %v237_v36 }
 0x25d   :  { %v343_v43 = vmul.f32 %v340_v42, %v329_v40  ;;  %v328_v44 = vmax.f32 %v320_v41, 0.0 }
 0x25f   :  { %v344_v46 = vsel %vm45_vm0, %v343_v43, 0.0  ;;  %v342_v47 = vmul.f32 %v335_v45, %v328_v44 }
 0x261   :  { %v345_v49 = vadd.f32 %v344_v46, %v342_v47 }
 0x263   :  { %v346_v50 = vrot.slane %v345_v49, 4 }
 0x265   :  { %v347_v52 = vadd.f32 %v346_v50, %v345_v49 }
 0x267   :  { %v348_v53 = vrot.slane %v347_v52, 2 }
 0x269   :  { %v349_v55 = vadd.f32 %v348_v53, %v347_v52 }
 0x26b   :  { %v350_v57 = vrot.slane %v349_v55, 1 }
 0x26d   :  { %v351_v59 = vadd.f32 %v350_v57, %v349_v55 }
 0x26f   :  { %v362_v60 = vadd.f32 %v361_v58, %v351_v59 }
 0x271   :  { %363 = vst [vmem:[%s524_s5] sm:$0x1] %v362_v60 }

</bundles_post_ra>
